<compile_context>
chip_gen: v7x
topology: tpu7x:2x2x1
jax: 0.10.0
libtpu: 0.0.40
codegen_flags: <defaults>
</compile_context>

<pallas_src>
import functools

import jax
import jax.numpy as jnp
from jax.experimental import pallas as pl
from jax.experimental.pallas import tpu as pltpu


def _star_kernel(ab_ref, x_ref, w1_ref, b1_ref, w2_ref, b2_ref,
                 w3a_ref, w3b_ref, b3_ref, w4_ref, b4_ref, o_ref,
                 *, tb, channels):
    alpha = ab_ref[0]
    beta = ab_ref[1]

    tm = tb * channels
    d = o_ref.shape[-1]
    dc = w2_ref.shape[-1]

    def asym_cauchy(v):
        relu_p = jnp.maximum(v, 0.0)
        relu_n = jnp.maximum(-v, 0.0)
        pos = pl.reciprocal(1.0 + alpha * relu_n * relu_n, approx=True)
        neg = pl.reciprocal(1.0 + beta * relu_p * relu_p, approx=True)
        return pos - neg

    xb = x_ref[...].astype(jnp.bfloat16)                       # (TM, D)

    # gen1 + activation  (bf16 MXU, f32 accumulate)
    h1 = asym_cauchy(
        jnp.dot(xb, w1_ref[...], preferred_element_type=jnp.float32)
        + b1_ref[...])

    # gen2
    cm = jnp.dot(h1.astype(jnp.bfloat16), w2_ref[...],
                 preferred_element_type=jnp.float32) + b2_ref[...]   # (TM, dc)

    # eval branch: per-batch softmax over channels + weighted pooling
    cm3 = cm.reshape(tb, channels, dc)
    m = jnp.max(cm3, axis=1, keepdims=True)
    e = jnp.exp(cm3 - m)
    inv = pl.reciprocal(jnp.sum(e, axis=1, keepdims=True), approx=True)
    w = e * inv
    pooled = jnp.sum(cm3 * w, axis=1)                           # (TB, dc)

    # gen3 on concat([x, pooled_bcast]) as split matmuls:
    #   x-part: (TM, D) @ (D, D)   core-part: (TB, dc) @ (dc, D)
    xw3 = jnp.dot(xb, w3a_ref[...], preferred_element_type=jnp.float32) \
        + b3_ref[...]
    pw3 = jnp.dot(pooled.astype(jnp.bfloat16), w3b_ref[...],
                  preferred_element_type=jnp.float32)           # (TB, D)
    pre3 = xw3.reshape(tb, channels, d) + pw3.reshape(tb, 1, d)
    h3 = asym_cauchy(pre3).reshape(tm, d)

    # gen4
    out = jnp.dot(h3.astype(jnp.bfloat16), w4_ref[...],
                  preferred_element_type=jnp.float32) + b4_ref[...]
    o_ref[...] = out.astype(o_ref.dtype)


def star_forward(x, params, *, tb=None):
    B, C, D = x.shape
    dc = params["w2"].shape[1]

    # Pick TB so the matmul M dimension (TB*C) is ~256 rows, TB | B, and the
    # row-block is sublane-aligned (multiple of 8) or covers all rows.
    if tb is None:
        tb = max(1, min(B, 256 // max(C, 1)))
    tb = max(1, min(tb, B))
    while B % tb:
        tb -= 1
    tm = tb * C
    if (tm % 8) and (tm != B * C):
        tb, tm = B, B * C

    x2 = x.reshape(B * C, D)

    bf = jnp.bfloat16
    w1 = params["w1"].astype(bf)
    w2 = params["w2"].astype(bf)
    w3a = params["w3a"].astype(bf)
    w3b = params["w3b"].astype(bf)
    w4 = params["w4"].astype(bf)

    def full(shape):
        return pl.BlockSpec(shape, lambda i: (0,) * len(shape))

    kernel = functools.partial(_star_kernel, tb=tb, channels=C)

    out2 = pl.pallas_call(
        kernel,
        out_shape=jax.ShapeDtypeStruct((B * C, D), x.dtype),
        grid=(B // tb,),
        in_specs=[
            pl.BlockSpec(memory_space=pltpu.MemorySpace.SMEM),   # alpha, beta
            pl.BlockSpec((tm, D), lambda i: (i, 0)),             # x rows
            full((D, D)),                                        # w1
            full((1, D)),                                        # b1
            full((D, dc)),                                       # w2
            full((1, dc)),                                       # b2
            full((D, D)),                                        # w3a (input part)
            full((dc, D)),                                       # w3b (core part)
            full((1, D)),                                        # b3
            full((D, D)),                                        # w4
            full((1, D)),                                        # b4
        ],
        out_specs=pl.BlockSpec((tm, D), lambda i: (i, 0)),
        compiler_params=pltpu.CompilerParams(
            dimension_semantics=("parallel",)),
    )(params["ab"], x2, w1, params["b1"], w2, params["b2"],
      w3a, w3b, params["b3"], w4, params["b4"])
    return out2.reshape(B, C, D)


def star_reference(x, params):
    alpha, beta = params["ab"][0], params["ab"][1]

    def asym_cauchy(v):
        relu_v = jnp.maximum(v, 0.0)
        relu_nv = jnp.maximum(-v, 0.0)
        return 1.0 / (1.0 + alpha * relu_nv ** 2) - 1.0 / (1.0 + beta * relu_v ** 2)

    h1 = asym_cauchy(x @ params["w1"] + params["b1"])
    cm = h1 @ params["w2"] + params["b2"]                        # (B, C, dc)
    w = jax.nn.softmax(cm, axis=1)
    pooled = jnp.sum(cm * w, axis=1, keepdims=True)              # (B, 1, dc)
    pooled = jnp.broadcast_to(pooled, cm.shape)
    cat = jnp.concatenate([x, pooled], axis=-1)
    w3 = jnp.concatenate([params["w3a"], params["w3b"]], axis=0)
    h3 = asym_cauchy(cat @ w3 + params["b3"])
    return h3 @ params["w4"] + params["b4"]


if __name__ == "__main__":
    B, C, D, DC = 8, 8, 32, 16   # batch, channels, d_series, d_core

    key = jax.random.PRNGKey(0)
    ks = jax.random.split(key, 10)
    scale = 0.1
    params = {
        "ab":  jnp.array([1.0, 1.0], dtype=jnp.float32),         # alpha, beta
        "w1":  scale * jax.random.normal(ks[0], (D, D), jnp.float32),
        "b1":  scale * jax.random.normal(ks[1], (1, D), jnp.float32),
        "w2":  scale * jax.random.normal(ks[2], (D, DC), jnp.float32),
        "b2":  scale * jax.random.normal(ks[3], (1, DC), jnp.float32),
        "w3a": scale * jax.random.normal(ks[4], (D, D), jnp.float32),
        "w3b": scale * jax.random.normal(ks[5], (DC, D), jnp.float32),
        "b3":  scale * jax.random.normal(ks[6], (1, D), jnp.float32),
        "w4":  scale * jax.random.normal(ks[7], (D, D), jnp.float32),
        "b4":  scale * jax.random.normal(ks[8], (1, D), jnp.float32),
    }
    x = jax.random.normal(ks[9], (B, C, D), jnp.float32)

    # Small tb to exercise a multi-step grid; default heuristic picks ~256 rows.
    out = star_forward(x, params, tb=2)
    out = jax.block_until_ready(out)

    ref = star_reference(x, params)
    assert out.shape == (B, C, D)
    # Tolerance loosened vs f32: kernel uses bf16 MXU operands and EUP approx
    # reciprocals (activation + softmax), per the performance review.
    assert jnp.allclose(out, ref, atol=3e-2, rtol=3e-2), "mismatch vs reference"
    print("KERNEL_OK")
</pallas_src>

<mosaic_0001>
module attributes {stable_mosaic.version = 11 : i64} {
  func.func @_star_kernel(%arg0: i32, %arg1: memref<2xf32, #tpu.memory_space<smem>>, %arg2: memref<16x32xf32, #tpu.memory_space<vmem>>, %arg3: memref<32x32xbf16, #tpu.memory_space<vmem>>, %arg4: memref<1x32xf32, #tpu.memory_space<vmem>>, %arg5: memref<32x16xbf16, #tpu.memory_space<vmem>>, %arg6: memref<1x16xf32, #tpu.memory_space<vmem>>, %arg7: memref<32x32xbf16, #tpu.memory_space<vmem>>, %arg8: memref<16x32xbf16, #tpu.memory_space<vmem>>, %arg9: memref<1x32xf32, #tpu.memory_space<vmem>>, %arg10: memref<32x32xbf16, #tpu.memory_space<vmem>>, %arg11: memref<1x32xf32, #tpu.memory_space<vmem>>, %arg12: memref<16x32xf32, #tpu.memory_space<vmem>>) attributes {dimension_semantics = [#tpu.dimension_semantics<parallel>], iteration_bounds = array<i64: 4>, scalar_prefetch = 0 : i64, scratch_operands = 0 : i64, tpu.core_type = #tpu.core_type<tc>, window_params = [{transform_indices = @transform_0, window_bounds = array<i64: 2>}, {transform_indices = @transform_1, window_bounds = array<i64: 16, 32>}, {pipeline_mode = #tpu.pipeline_mode<synchronous>, transform_indices = @transform_2, window_bounds = array<i64: 32, 32>}, {pipeline_mode = #tpu.pipeline_mode<synchronous>, transform_indices = @transform_3, window_bounds = array<i64: 1, 32>}, {pipeline_mode = #tpu.pipeline_mode<synchronous>, transform_indices = @transform_4, window_bounds = array<i64: 32, 16>}, {pipeline_mode = #tpu.pipeline_mode<synchronous>, transform_indices = @transform_5, window_bounds = array<i64: 1, 16>}, {pipeline_mode = #tpu.pipeline_mode<synchronous>, transform_indices = @transform_6, window_bounds = array<i64: 32, 32>}, {pipeline_mode = #tpu.pipeline_mode<synchronous>, transform_indices = @transform_7, window_bounds = array<i64: 16, 32>}, {pipeline_mode = #tpu.pipeline_mode<synchronous>, transform_indices = @transform_8, window_bounds = array<i64: 1, 32>}, {pipeline_mode = #tpu.pipeline_mode<synchronous>, transform_indices = @transform_9, window_bounds = array<i64: 32, 32>}, {pipeline_mode = #tpu.pipeline_mode<synchronous>, transform_indices = @transform_10, window_bounds = array<i64: 1, 32>}, {transform_indices = @transform_11, window_bounds = array<i64: 16, 32>}]} {
    %c0 = arith.constant 0 : index
    %0 = memref.load %arg1[%c0] : memref<2xf32, #tpu.memory_space<smem>>
    %c1 = arith.constant 1 : index
    %1 = memref.load %arg1[%c1] : memref<2xf32, #tpu.memory_space<smem>>
    %c0_0 = arith.constant 0 : index
    %c0_1 = arith.constant 0 : index
    %2 = vector.load %arg2[%c0_0, %c0_1] : memref<16x32xf32, #tpu.memory_space<vmem>>, vector<16x32xf32>
    %3 = arith.truncf %2 : vector<16x32xf32> to vector<16x32xbf16>
    %c0_2 = arith.constant 0 : index
    %c0_3 = arith.constant 0 : index
    %4 = vector.load %arg3[%c0_2, %c0_3] : memref<32x32xbf16, #tpu.memory_space<vmem>>, vector<32x32xbf16>
    %cst = arith.constant dense<0.000000e+00> : vector<16x32xf32>
    %5 = tpu.matmul %3, %4, %cst {dimension_numbers = #tpu.dot_dimension_numbers<[1], [0], [0], [1], [0, 0, 1, 1], [], []>} : vector<16x32xbf16>, vector<32x32xbf16>, vector<16x32xf32> -> vector<16x32xf32>
    %c0_4 = arith.constant 0 : index
    %c0_5 = arith.constant 0 : index
    %6 = vector.load %arg4[%c0_4, %c0_5] : memref<1x32xf32, #tpu.memory_space<vmem>>, vector<1x32xf32>
    %7 = vector.broadcast %6 : vector<1x32xf32> to vector<16x32xf32>
    %8 = arith.addf %5, %7 : vector<16x32xf32>
    %cst_6 = arith.constant 0.000000e+00 : f32
    %9 = vector.broadcast %cst_6 : f32 to vector<16x32xf32>
    %10 = arith.maximumf %8, %9 : vector<16x32xf32>
    %cst_7 = arith.constant 0.000000e+00 : f32
    %11 = vector.broadcast %cst_7 : f32 to vector<16x32xf32>
    %12 = arith.subf %11, %8 : vector<16x32xf32>
    %cst_8 = arith.constant 0.000000e+00 : f32
    %13 = vector.broadcast %cst_8 : f32 to vector<16x32xf32>
    %14 = arith.maximumf %12, %13 : vector<16x32xf32>
    %15 = vector.broadcast %0 : f32 to vector<16x32xf32>
    %16 = arith.mulf %15, %14 : vector<16x32xf32>
    %17 = arith.mulf %16, %14 : vector<16x32xf32>
    %cst_9 = arith.constant 1.000000e+00 : f32
    %18 = vector.broadcast %cst_9 : f32 to vector<16x32xf32>
    %19 = arith.addf %18, %17 : vector<16x32xf32>
    %20 = tpu.reciprocal %19 {approx = true} : vector<16x32xf32> -> vector<16x32xf32>
    %21 = vector.broadcast %1 : f32 to vector<16x32xf32>
    %22 = arith.mulf %21, %10 : vector<16x32xf32>
    %23 = arith.mulf %22, %10 : vector<16x32xf32>
    %cst_10 = arith.constant 1.000000e+00 : f32
    %24 = vector.broadcast %cst_10 : f32 to vector<16x32xf32>
    %25 = arith.addf %24, %23 : vector<16x32xf32>
    %26 = tpu.reciprocal %25 {approx = true} : vector<16x32xf32> -> vector<16x32xf32>
    %27 = arith.subf %20, %26 : vector<16x32xf32>
    %28 = arith.truncf %27 : vector<16x32xf32> to vector<16x32xbf16>
    %c0_11 = arith.constant 0 : index
    %c0_12 = arith.constant 0 : index
    %29 = vector.load %arg5[%c0_11, %c0_12] : memref<32x16xbf16, #tpu.memory_space<vmem>>, vector<32x16xbf16>
    %cst_13 = arith.constant dense<0.000000e+00> : vector<16x16xf32>
    %30 = tpu.matmul %28, %29, %cst_13 {dimension_numbers = #tpu.dot_dimension_numbers<[1], [0], [0], [1], [0, 0, 1, 1], [], []>} : vector<16x32xbf16>, vector<32x16xbf16>, vector<16x16xf32> -> vector<16x16xf32>
    %c0_14 = arith.constant 0 : index
    %c0_15 = arith.constant 0 : index
    %31 = vector.load %arg6[%c0_14, %c0_15] : memref<1x16xf32, #tpu.memory_space<vmem>>, vector<1x16xf32>
    %32 = vector.broadcast %31 : vector<1x16xf32> to vector<16x16xf32>
    %33 = arith.addf %30, %32 : vector<16x16xf32>
    %34 = vector.shape_cast %33 : vector<16x16xf32> to vector<2x8x16xf32>
    %cst_16 = arith.constant dense<0xFF800000> : vector<2x16xf32>
    %35 = vector.multi_reduction <maximumf>, %34, %cst_16 [1] : vector<2x8x16xf32> to vector<2x16xf32>
    %36 = vector.shape_cast %35 : vector<2x16xf32> to vector<2x1x16xf32>
    %37 = vector.broadcast %36 : vector<2x1x16xf32> to vector<2x8x16xf32>
    %38 = arith.subf %34, %37 : vector<2x8x16xf32>
    %39 = math.exp %38 : vector<2x8x16xf32>
    %cst_17 = arith.constant dense<0.000000e+00> : vector<2x16xf32>
    %40 = vector.multi_reduction <add>, %39, %cst_17 [1] : vector<2x8x16xf32> to vector<2x16xf32>
    %41 = vector.shape_cast %40 : vector<2x16xf32> to vector<2x1x16xf32>
    %42 = tpu.reciprocal %41 {approx = true} : vector<2x1x16xf32> -> vector<2x1x16xf32>
    %43 = vector.broadcast %42 : vector<2x1x16xf32> to vector<2x8x16xf32>
    %44 = arith.mulf %39, %43 : vector<2x8x16xf32>
    %45 = arith.mulf %34, %44 : vector<2x8x16xf32>
    %cst_18 = arith.constant dense<0.000000e+00> : vector<2x16xf32>
    %46 = vector.multi_reduction <add>, %45, %cst_18 [1] : vector<2x8x16xf32> to vector<2x16xf32>
    %c0_19 = arith.constant 0 : index
    %c0_20 = arith.constant 0 : index
    %47 = vector.load %arg7[%c0_19, %c0_20] : memref<32x32xbf16, #tpu.memory_space<vmem>>, vector<32x32xbf16>
    %cst_21 = arith.constant dense<0.000000e+00> : vector<16x32xf32>
    %48 = tpu.matmul %3, %47, %cst_21 {dimension_numbers = #tpu.dot_dimension_numbers<[1], [0], [0], [1], [0, 0, 1, 1], [], []>} : vector<16x32xbf16>, vector<32x32xbf16>, vector<16x32xf32> -> vector<16x32xf32>
    %c0_22 = arith.constant 0 : index
    %c0_23 = arith.constant 0 : index
    %49 = vector.load %arg9[%c0_22, %c0_23] : memref<1x32xf32, #tpu.memory_space<vmem>>, vector<1x32xf32>
    %50 = vector.broadcast %49 : vector<1x32xf32> to vector<16x32xf32>
    %51 = arith.addf %48, %50 : vector<16x32xf32>
    %52 = arith.truncf %46 : vector<2x16xf32> to vector<2x16xbf16>
    %c0_24 = arith.constant 0 : index
    %c0_25 = arith.constant 0 : index
    %53 = vector.load %arg8[%c0_24, %c0_25] : memref<16x32xbf16, #tpu.memory_space<vmem>>, vector<16x32xbf16>
    %cst_26 = arith.constant dense<0.000000e+00> : vector<2x32xf32>
    %54 = tpu.matmul %52, %53, %cst_26 {dimension_numbers = #tpu.dot_dimension_numbers<[1], [0], [0], [1], [0, 0, 1, 1], [], []>} : vector<2x16xbf16>, vector<16x32xbf16>, vector<2x32xf32> -> vector<2x32xf32>
    %55 = vector.shape_cast %51 : vector<16x32xf32> to vector<2x8x32xf32>
    %56 = vector.shape_cast %54 : vector<2x32xf32> to vector<2x1x32xf32>
    %57 = vector.broadcast %56 : vector<2x1x32xf32> to vector<2x8x32xf32>
    %58 = arith.addf %55, %57 : vector<2x8x32xf32>
    %cst_27 = arith.constant 0.000000e+00 : f32
    %59 = vector.broadcast %cst_27 : f32 to vector<2x8x32xf32>
    %60 = arith.maximumf %58, %59 : vector<2x8x32xf32>
    %cst_28 = arith.constant 0.000000e+00 : f32
    %61 = vector.broadcast %cst_28 : f32 to vector<2x8x32xf32>
    %62 = arith.subf %61, %58 : vector<2x8x32xf32>
    %cst_29 = arith.constant 0.000000e+00 : f32
    %63 = vector.broadcast %cst_29 : f32 to vector<2x8x32xf32>
    %64 = arith.maximumf %62, %63 : vector<2x8x32xf32>
    %65 = vector.broadcast %0 : f32 to vector<2x8x32xf32>
    %66 = arith.mulf %65, %64 : vector<2x8x32xf32>
    %67 = arith.mulf %66, %64 : vector<2x8x32xf32>
    %cst_30 = arith.constant 1.000000e+00 : f32
    %68 = vector.broadcast %cst_30 : f32 to vector<2x8x32xf32>
    %69 = arith.addf %68, %67 : vector<2x8x32xf32>
    %70 = tpu.reciprocal %69 {approx = true} : vector<2x8x32xf32> -> vector<2x8x32xf32>
    %71 = vector.broadcast %1 : f32 to vector<2x8x32xf32>
    %72 = arith.mulf %71, %60 : vector<2x8x32xf32>
    %73 = arith.mulf %72, %60 : vector<2x8x32xf32>
    %cst_31 = arith.constant 1.000000e+00 : f32
    %74 = vector.broadcast %cst_31 : f32 to vector<2x8x32xf32>
    %75 = arith.addf %74, %73 : vector<2x8x32xf32>
    %76 = tpu.reciprocal %75 {approx = true} : vector<2x8x32xf32> -> vector<2x8x32xf32>
    %77 = arith.subf %70, %76 : vector<2x8x32xf32>
    %78 = vector.shape_cast %77 : vector<2x8x32xf32> to vector<16x32xf32>
    %79 = arith.truncf %78 : vector<16x32xf32> to vector<16x32xbf16>
    %c0_32 = arith.constant 0 : index
    %c0_33 = arith.constant 0 : index
    %80 = vector.load %arg10[%c0_32, %c0_33] : memref<32x32xbf16, #tpu.memory_space<vmem>>, vector<32x32xbf16>
    %cst_34 = arith.constant dense<0.000000e+00> : vector<16x32xf32>
    %81 = tpu.matmul %79, %80, %cst_34 {dimension_numbers = #tpu.dot_dimension_numbers<[1], [0], [0], [1], [0, 0, 1, 1], [], []>} : vector<16x32xbf16>, vector<32x32xbf16>, vector<16x32xf32> -> vector<16x32xf32>
    %c0_35 = arith.constant 0 : index
    %c0_36 = arith.constant 0 : index
    %82 = vector.load %arg11[%c0_35, %c0_36] : memref<1x32xf32, #tpu.memory_space<vmem>>, vector<1x32xf32>
    %83 = vector.broadcast %82 : vector<1x32xf32> to vector<16x32xf32>
    %84 = arith.addf %81, %83 : vector<16x32xf32>
    %c0_37 = arith.constant 0 : index
    %c0_38 = arith.constant 0 : index
    %85 = vector.load %arg12[%c0_37, %c0_38] : memref<16x32xf32, #tpu.memory_space<vmem>>, vector<16x32xf32>
    tpu.vector_store %arg12[%c0_37, %c0_38], %84 {strides = array<i32>} : memref<16x32xf32, #tpu.memory_space<vmem>>, vector<16x32xf32>,
    return
  }
  func.func @transform_0(%arg0: i32) -> i32 {
    %c0_i32 = arith.constant 0 : i32
    %c0_i32_0 = arith.constant 0 : i32
    return %c0_i32 : i32
  }
  func.func @transform_1(%arg0: i32) -> (i32, i32) {
    %c0_i32 = arith.constant 0 : i32
    %c0_i32_0 = arith.constant 0 : i32
    return %arg0, %c0_i32 : i32, i32
  }
  func.func @transform_2(%arg0: i32) -> (i32, i32) {
    %c0_i32 = arith.constant 0 : i32
    %c0_i32_0 = arith.constant 0 : i32
    %c0_i32_1 = arith.constant 0 : i32
    return %c0_i32, %c0_i32_0 : i32, i32
  }
  func.func @transform_3(%arg0: i32) -> (i32, i32) {
    %c0_i32 = arith.constant 0 : i32
    %c0_i32_0 = arith.constant 0 : i32
    %c0_i32_1 = arith.constant 0 : i32
    return %c0_i32, %c0_i32_0 : i32, i32
  }
  func.func @transform_4(%arg0: i32) -> (i32, i32) {
    %c0_i32 = arith.constant 0 : i32
    %c0_i32_0 = arith.constant 0 : i32
    %c0_i32_1 = arith.constant 0 : i32
    return %c0_i32, %c0_i32_0 : i32, i32
  }
  func.func @transform_5(%arg0: i32) -> (i32, i32) {
    %c0_i32 = arith.constant 0 : i32
    %c0_i32_0 = arith.constant 0 : i32
    %c0_i32_1 = arith.constant 0 : i32
    return %c0_i32, %c0_i32_0 : i32, i32
  }
  func.func @transform_6(%arg0: i32) -> (i32, i32) {
    %c0_i32 = arith.constant 0 : i32
    %c0_i32_0 = arith.constant 0 : i32
    %c0_i32_1 = arith.constant 0 : i32
    return %c0_i32, %c0_i32_0 : i32, i32
  }
  func.func @transform_7(%arg0: i32) -> (i32, i32) {
    %c0_i32 = arith.constant 0 : i32
    %c0_i32_0 = arith.constant 0 : i32
    %c0_i32_1 = arith.constant 0 : i32
    return %c0_i32, %c0_i32_0 : i32, i32
  }
  func.func @transform_8(%arg0: i32) -> (i32, i32) {
    %c0_i32 = arith.constant 0 : i32
    %c0_i32_0 = arith.constant 0 : i32
    %c0_i32_1 = arith.constant 0 : i32
    return %c0_i32, %c0_i32_0 : i32, i32
  }
  func.func @transform_9(%arg0: i32) -> (i32, i32) {
    %c0_i32 = arith.constant 0 : i32
    %c0_i32_0 = arith.constant 0 : i32
    %c0_i32_1 = arith.constant 0 : i32
    return %c0_i32, %c0_i32_0 : i32, i32
  }
  func.func @transform_10(%arg0: i32) -> (i32, i32) {
    %c0_i32 = arith.constant 0 : i32
    %c0_i32_0 = arith.constant 0 : i32
    %c0_i32_1 = arith.constant 0 : i32
    return %c0_i32, %c0_i32_0 : i32, i32
  }
  func.func @transform_11(%arg0: i32) -> (i32, i32) {
    %c0_i32 = arith.constant 0 : i32
    %c0_i32_0 = arith.constant 0 : i32
    return %arg0, %c0_i32 : i32, i32
  }
}

</mosaic_0001>

<bundles_post_ra>
// kernel: tpu_custom_call.1
= control target key start
LH: loop header
LB: loop body
LE: loop exit
PB: predicated region body
PF: predicated region fallthrough
CT: control target
= control target key end

     0   :  { %16 = vsyncpa [#allocation3], 0  ;;  %s1178_s17 = smov 0   ;;  %s1310_s0 = inlined_call_operand.vmem [shape: f32[2], index: 0, kind: input, shape index: {}]   ;;  %s1311_s1 = inlined_call_operand.vmem [shape: f32[64,32], index: 1, kind: input, shape index: {}]   ;;  %s1312_s2 = inlined_call_operand.vmem [shape: bf16[32,32], index: 2, kind: input, shape index: {}]   ;;  %s1313_s3 = inlined_call_operand.vmem [shape: f32[1,32], index: 3, kind: input, shape index: {}]   ;;  %s1314_s4 = inlined_call_operand.vmem [shape: bf16[32,16], index: 4, kind: input, shape index: {}]   ;;  %s1315_s5 = inlined_call_operand.vmem [shape: f32[1,16], index: 5, kind: input, shape index: {}]   ;;  %s1316_s6 = inlined_call_operand.vmem [shape: bf16[32,32], index: 6, kind: input, shape index: {}]   ;;  %s1317_s7 = inlined_call_operand.vmem [shape: bf16[16,32], index: 7, kind: input, shape index: {}]   ;;  %s1318_s8 = inlined_call_operand.vmem [shape: f32[1,32], index: 8, kind: input, shape index: {}]   ;;  %s1319_s9 = inlined_call_operand.vmem [shape: bf16[32,32], index: 9, kind: input, shape index: {}]   ;;  %s1320_s10 = inlined_call_operand.vmem [shape: f32[1,32], index: 10, kind: input, shape index: {}]   ;;  %s1321_s11 = inlined_call_operand.vmem [shape: f32[64,32], index: 11, kind: output, shape index: {}]  }
   0x1 LB: > { %s948_s18 = sadd.s32 4294967295, %s1112_s17   ;;  %p950_p0 = scmp.ge.s32.totalorder %s1112_s17, 1  ;;  %s1112_s17 = sphi %s1178_s17, %s22_s17  }
   0x2   : > { %p289_p1 = scmp.lt.s32.totalorder %s1112_s17, 5  ;;  %s302_s21 = sshll.u32 %s1310_s0, 4  ;;  %s303_s21 = int_to_ptr.vmem [resolvable:$true] %s302_s21 }
   0x3   : > { %p1195_p3 = scmp.eq.s32.totalorder %s948_s18, 0  ;;  %s1087_s24 = scalar_lea.vmem %s303_s21, 16 }
   0x4   : > { %p1189_p2 = pnand %p950_p0, %p289_p1  ;;  %p1088_p6 = scmp.ne.s32.totalorder %s303_s21, %s1087_s24 }
   0x5   : > { %p1095_p10 = scmp.lt.s32.totalorder %s303_s21, %s303_s21  ;;  %p1096_p11 = scmp.lt.s32.totalorder %s1087_s24, %s1087_s24 }
   0x6   : > { %p1036_p4 = pneg %p1189_p2 }
   0x7   : > { %p1097_p12 = por %p1096_p11, %p1095_p10 }
   0x8   : > { %p1037_p5 = pnand %p1195_p3, %p1036_p4 }
   0xa   : > { %p1089_p7 = pneg %p1037_p5 }
   0xc   : > { %p1090_p8 = pnand %p1089_p7, %p1088_p6 }
   0xe   : > { %p1091_p9 = pneg %p1090_p8 }
  0x10   : > { %p1098_p13 = pnand %p1097_p12, %p1091_p9 }
  0x12   : > { %1101 = shalt.err (!%p1098_p13)
}
  0x13   : > { %s1114_s25 = smov [#allocation2]   ;;  %351 = sbr.rel (%p1189_p2) target bundleno = 1035 (0x40b), region = 64 }
  0x14   : > { %1039 = dma.vmem_to_smem (!%p1037_p5), %s303_s21, 16, %s1114_s25, [#allocation3]  }
  0x1a   : > { %1107 = dma.done.wait (%p1195_p3), [#allocation3], 16  }
  0x1b   : > { %1109 = vsyncadd (%p1195_p3), [#allocation3], 4294967280 }
  0x1c   : > { %357 = sfence }
  0x1d   : > { %v1054_v0 = vld [vmem:[%s1312_s2] sm:$0xff]   ;;  %v1115_v1 = vmov 0.0   ;;  %v1055_v2 = vld [vmem:[%s1312_s2 + $0x8] sm:$0xff]   ;;  %vm1116_vm0 = vmmov 0   ;;  %s955_s30 = sshll.u32 %s948_s18, 1  ;;  %vm433_vm1 = vcmask 261120  }
  0x1e   : > { %994 = vmatprep.subr.bf16.mxu0 %v1115_v1  ;;  %1002 = vmatprep.subr.bf16.mxu1 %v1115_v1  ;;  %p393_p0 = scmp.lt.s32.totalorder %s955_s30, 7  ;;  %v1056_v6 = vld [vmem:[%s1314_s4] sm:$0xff]   ;;  %v1057_v7 = vld [vmem:[%s1314_s4 + $0x8] sm:$0xff]   ;;  %s959_s21 = sld [smem:[#allocation2 + $0x1]]  ;;  %vm572_vm2 = vcmask 130048   ;;  %vm699_vm3 = vcmask 1041409  }
  0x1f   : > { %995 = vmatpush3.bf16.msra.mxu0 %v1054_v0  ;;  %998 = vmatprep.mubr.msk.bf16.mxu0 %vm1116_vm0, %v1115_v1  ;;  %s405_s22 = sld [smem:[#allocation2]]  ;;  %v960_v8 = vld [vmem:[%s1313_s3] ss:$0 sm:$0xff]  ;;  %v1060_v44 = vld [vmem:[%s1316_s6 + $0x8] sm:$0xff]  }
  0x20   : > { %996 = vmatprep.subr.bf16.mxu0 %v1115_v1  ;;  %1006 = vmatprep.mubr.msk.bf16.mxu1 %vm1116_vm0, %v1115_v1  ;;  %s1325_s30 = smov (!%p393_p0, %s955_s30), 7  ;;  %v1059_v42 = vld [vmem:[%s1316_s6] sm:$0xff]  }
  0x21   : > { %s956_s12 = sshll.u32 %s1325_s30, 3  ;;  %1003 = vmatpush3.bf16.msra.mxu1 %v1056_v6  ;;  %v1058_v43 = vld [vmem:[%s1317_s7] sm:$0xff]  }
  0x22   : > { %s396_s15 = scalar_lea.vmem %s1311_s1, %s956_s12  ;;  %1004 = vmatprep.subr.bf16.mxu1 %v1115_v1  ;;  %v964_v45 = vld [vmem:[%s1315_s5] ss:$0 sm:$0xff]  ;;  %s402_s27 = scalar_lea.vmem %s1321_s11, %s956_s12 }
  0x23   : > { %997 = vmatpush3.bf16.msra.mxu0 %v1055_v2  ;;  %v407_v3 = vld [vmem:[%s396_s15] sm:$0xff]  ;;  %v408_v4 = vld [vmem:[%s396_s15 + $0x8] sm:$0xff] }
  0x24   : > { %1010 = vmatprep.subr.bf16.mxu0 %v1115_v1  ;;  %v409_v5 = vpack.c.bf16 %v408_v4, %v407_v3  ;;  %v1247_v12 = vstv %s959_s21 }
  0x25   : > { %1005 = vmatpush3.bf16.msra.mxu1 %v1057_v7  ;;  %v1249_v18 = vstv %s405_s22 }
  0x26   : > { %999 = vmatmul.mubr.msk.bf16.vlgmr.msra.gmra.mrb[0].mxu0 %vm433_vm1, %v409_v5  ;;  %1018 = vmatprep.subr.bf16.mxu1 %v1115_v1 }
  0x27   : > { %1014 = vmatprep.mubr.msk.bf16.mxu0 %vm1116_vm0, %v1115_v1  ;;  %1011 = vmatpush3.bf16.msra.mxu0 %v1059_v42 }
  0x28   : > { %1012 = vmatprep.subr.bf16.mxu0 %v1115_v1 }
  0x2b   : > { %1013 = vmatpush3.bf16.msra.mxu0 %v1060_v44 }
  0x2c   : > { %1024 = vmatprep.subr.bf16.mxu0 %v1115_v1 }
  0x2e   : > { %1015 = vmatmul.mubr.msk.bf16.vlgmr.msra.gmra.mrb[4].mxu0 %vm433_vm1, %v409_v5 }
  0x2f   : > { %1028 = vmatprep.mubr.msk.bf16.mxu0 %vm1116_vm0, %v1115_v1 }
  0xf9   : > { %v471_v9 = vpop.f32.mrb[0].mxu0 }
  0xfa   : > { %v472_v10 = vadd.f32 %v960_v8, %v471_v9  ;;  %v1000_v11 = vpop.f32.mrb[1].mxu0 }
  0xfb   : > { %v474_v13 = vpop.f32.mrb[2].mxu0 }
  0xfc   : > { %v478_v14 = vmax.f32 %v472_v10, 0.0  ;;  %v480_v15 = vsub.f32 0.0, %v472_v10  ;;  %v475_v16 = vadd.f32 %v960_v8, %v474_v13  ;;  %v1001_v17 = vpop.f32.mrb[3].mxu0 }
  0xfe   : > { %v482_v19 = vmax.f32 %v480_v15, 0.0  ;;  %v494_v20 = vmul.f32 %v1247_v12, %v478_v14  ;;  %v479_v21 = vmax.f32 %v475_v16, 0.0  ;;  %v481_v22 = vsub.f32 0.0, %v475_v16 }
 0x100   : > { %v485_v23 = vmul.f32 %v1249_v18, %v482_v19  ;;  %v496_v24 = vmul.f32 %v494_v20, %v478_v14  ;;  %v483_v25 = vmax.f32 %v481_v22, 0.0  ;;  %v495_v26 = vmul.f32 %v1247_v12, %v479_v21 }
 0x102   : > { %v487_v27 = vmul.f32 %v485_v23, %v482_v19  ;;  %v498_v28 = vadd.f32 1.0, %v496_v24  ;;  %v486_v29 = vmul.f32 %v1249_v18, %v483_v25  ;;  %v497_v30 = vmul.f32 %v495_v26, %v479_v21 }
 0x104   : > { %v489_v31 = vadd.f32 1.0, %v487_v27  ;;  %v488_v32 = vmul.f32 %v486_v29, %v483_v25  ;;  %v499_v33 = vadd.f32 1.0, %v497_v30  ;;  %1063 = vrcp.f32 %v498_v28 }
 0x106   : > { %1065 = vrcp.f32 %v489_v31  ;;  %v490_v34 = vadd.f32 1.0, %v488_v32 }
 0x107   : > { %1067 = vrcp.f32 %v499_v33 }
 0x108   : > { %1069 = vrcp.f32 %v490_v34 }
 0x10e   : > { %v1064_v35 = vpop.eup %1063 }
 0x110   : > { %v1066_v36 = vpop.eup %1065 }
 0x111   : > { %v1068_v37 = vpop.eup %1067  ;;  %v502_v39 = vsub.f32 %v1066_v36, %v1064_v35 }
 0x112   : > { %v1070_v38 = vpop.eup %1069 }
 0x113   : > { %v503_v40 = vsub.f32 %v1070_v38, %v1068_v37 }
 0x115   : > { %v504_v41 = vpack.c.bf16 %v503_v40, %v502_v39 }
 0x117   : > { %1007 = vmatmul.mubr.msk.bf16.vlgmr.msra.gmra.mrb[0].mxu1 %vm433_vm1, %v504_v41 }
 0x118   : > { %1020 = vmatprep.mubr.msk.bf16.mxu1 %vm1116_vm0, %v1115_v1  ;;  %1019 = vmatpush3.bf16.msra.mxu1 %v1058_v43 }
 0x1ea   : > { %v565_v46 = vpop.f32.mrb[0].mxu1 }
 0x1eb   : > { %v566_v47 = vadd.f32 %v964_v45, %v565_v46  ;;  %v1008_v48 = vpop.f32.mrb[1].mxu1 }
 0x1ec   : > { %v568_v49 = vpop.f32.mrb[2].mxu1 }
 0x1ed   : > { %v573_v50 = vsel %vm572_vm2, %v566_v47, -inf  ;;  %v569_v51 = vadd.f32 %v964_v45, %v568_v49  ;;  %v1009_v52 = vpop.f32.mrb[3].mxu1 }
 0x1ee   : > { %v574_v53 = vrot.slane %v573_v50, 4 }
 0x1ef   : > { %v580_v54 = vsel %vm572_vm2, %v569_v51, -inf }
 0x1f0   : > { %v575_v55 = vmax.f32 %v573_v50, %v574_v53  ;;  %v581_v56 = vrot.slane %v580_v54, 4 }
 0x1f2   : > { %v576_v57 = vrot.slane %v575_v55, 2  ;;  %v582_v58 = vmax.f32 %v580_v54, %v581_v56  ;;  %v1062_v56 = vld [vmem:[%s1319_s9 + $0x8] sm:$0xff]  }
 0x1f4   : > { %v577_v59 = vmax.f32 %v575_v55, %v576_v57  ;;  %v583_v60 = vrot.slane %v582_v58, 2  ;;  %v1061_v55 = vld [vmem:[%s1319_s9] sm:$0xff]   ;;  %v1117_v57 = vmov 1966171168  }
 0x1f5   : > { %1025 = vmatpush3.bf16.msra.mxu0 %v1061_v55 }
 0x1f6   : > { %v578_v61 = vrot.slane %v577_v59, 1  ;;  %v584_v62 = vmax.f32 %v582_v58, %v583_v60  ;;  %1026 = vmatprep.subr.bf16.mxu0 %v1115_v1  ;;  %v753_v58 = vunpack.c.l.s4 %v1117_v57 }
 0x1f8   : > { %v579_v63 = vmax.f32 %v577_v59, %v578_v61  ;;  %v585_v0 = vrot.slane %v584_v62, 1  ;;  %v755_v59 = vlaneseq  ;;  %v754_v60 = vunpack.c.0.s8 %v753_v58 }
 0x1f9   : > { %1027 = vmatpush3.bf16.msra.mxu0 %v1062_v56 }
 0x1fa   : > { %v587_v2 = vsub.f32 %v566_v47, %v579_v63  ;;  %v586_v3 = vmax.f32 %v584_v62, %v585_v0  ;;  %v756_v61 = vshrl.u32 %v755_v59, 7  ;;  %v968_v0 = vld [vmem:[%s1318_s8] ss:$0 sm:$0xff] }
 0x1fc   : > { %v589_v4 = vmul.f32 1.442695, %v587_v2  ;;  %v588_v5 = vsub.f32 %v569_v51, %v586_v3  ;;  %v757_v62 = vsub.s32 %v754_v60, %v756_v61  ;;  %v776_v3 = vsub.s32 0, %v756_v61 }
 0x1fe   : > { %1071 = vpow2.f32 %v589_v4  ;;  %v591_v6 = vmul.f32 1.442695, %v588_v5 }
 0x200   : > { %1073 = vpow2.f32 %v591_v6 }
 0x208   : > { %v1072_v7 = vpop.eup %1071 }
 0x209   : > { %v593_v8 = vsel %vm572_vm2, %v1072_v7, 0.0 }
 0x20a   : > { %v1074_v9 = vpop.eup %1073  ;;  %v594_v10 = vrot.slane %v593_v8, 4 }
 0x20b   : > { %v600_v11 = vsel %vm572_vm2, %v1074_v9, 0.0 }
 0x20c   : > { %v595_v13 = vadd.f32 %v594_v10, %v593_v8  ;;  %v601_v14 = vrot.slane %v600_v11, 4 }
 0x20e   : > { %v596_v15 = vrot.slane %v595_v13, 2  ;;  %v602_v16 = vadd.f32 %v601_v14, %v600_v11 }
 0x210   : > { %v597_v17 = vadd.f32 %v596_v15, %v595_v13  ;;  %v603_v19 = vrot.slane %v602_v16, 2 }
 0x212   : > { %v598_v20 = vrot.slane %v597_v17, 1  ;;  %v604_v21 = vadd.f32 %v603_v19, %v602_v16 }
 0x214   : > { %v599_v22 = vadd.f32 %v598_v20, %v597_v17  ;;  %v605_v23 = vrot.slane %v604_v21, 1 }
 0x216   : > { %1075 = vrcp.f32 %v599_v22  ;;  %v606_v24 = vadd.f32 %v605_v23, %v604_v21 }
 0x218   : > { %1077 = vrcp.f32 %v606_v24 }
 0x220   : > { %v1076_v25 = vpop.eup %1075 }
 0x221   : > { %v609_v26 = vmul.f32 %v1076_v25, %v1072_v7 }
 0x222   : > { %v1078_v27 = vpop.eup %1077 }
 0x223   : > { %v611_v28 = vmul.f32 %v609_v26, %v566_v47  ;;  %v610_v29 = vmul.f32 %v1078_v27, %v1074_v9 }
 0x225   : > { %v613_v30 = vsel %vm572_vm2, %v611_v28, 0.0  ;;  %v612_v31 = vmul.f32 %v610_v29, %v569_v51  ;;  %v684_v51 = vpop.f32.mrb[4].mxu0 }
 0x226   : > { %v614_v32 = vrot.slane %v613_v30, 4  ;;  %v1016_v52 = vpop.f32.mrb[5].mxu0  ;;  %v685_v8 = vadd.f32 %v968_v0, %v684_v51 }
 0x227   : > { %v620_v33 = vsel %vm572_vm2, %v612_v31, 0.0  ;;  %v687_v53 = vpop.f32.mrb[6].mxu0 }
 0x228   : > { %v615_v34 = vadd.f32 %v614_v32, %v613_v30  ;;  %v621_v35 = vrot.slane %v620_v33, 4  ;;  %v1017_v54 = vpop.f32.mrb[7].mxu0  ;;  %v688_v13 = vadd.f32 %v968_v0, %v687_v53 }
 0x22a   : > { %v616_v36 = vrot.slane %v615_v34, 2  ;;  %v622_v37 = vadd.f32 %v621_v35, %v620_v33 }
 0x22c   : > { %v617_v38 = vadd.f32 %v616_v36, %v615_v34  ;;  %v623_v39 = vrot.slane %v622_v37, 2 }
 0x22e   : > { %v618_v40 = vrot.slane %v617_v38, 1  ;;  %v624_v41 = vadd.f32 %v623_v39, %v622_v37 }
 0x230   : > { %v619_v42 = vadd.f32 %v618_v40, %v617_v38  ;;  %v625_v43 = vrot.slane %v624_v41, 1 }
 0x232   : > { %v691_v44 = vpack.c.bf16 %v619_v42, %v619_v42  ;;  %v626_v45 = vadd.f32 %v625_v43, %v624_v41 }
 0x234   : > { %v692_v46 = vpack.c.bf16 %v626_v45, %v626_v45  ;;  %v697_v47 = vunpack.c.l.b16 %v691_v44 }
 0x236   : > { %v698_v48 = vunpack.c.l.b16 %v692_v46 }
 0x238   : > { %v700_v49 = vsel %vm699_vm3, %v698_v48, %v697_v47 }
 0x239   : > { %v701_v50 = vpack.c.b16 %v700_v49, %v700_v49 }
 0x23b   : > { %1021 = vmatmul.mubr.msk.bf16.vlgmr.msra.gmra.mrb[4].mxu1 %vm572_vm2, %v701_v50 }
 0x30e   : > { %v745_v63 = vpop.f32.mrb[4].mxu1 }
 0x30f   : > { %v758_v2 = vrot.slane %v745_v63, %v757_v62  ;;  %v1022_v4 = vpop.f32.mrb[5].mxu1 }
 0x310   : > { %v748_v5 = vpop.f32.mrb[6].mxu1 }
 0x311   : > { %v759_v6 = vcombine.high %v758_v2, %v758_v2  ;;  %v766_v7 = vrot.slane %v758_v2, %v757_v62  ;;  %v1023_v1 = vpop.f32.mrb[7].mxu1 }
 0x313   : > { %v773_v9 = vrot.slane %v759_v6, %v757_v62  ;;  %v777_v10 = vrot.slane %v766_v7, %v776_v3 }
 0x315   : > { %v784_v11 = vadd.f32 %v777_v10, %v685_v8  ;;  %v781_v14 = vrot.slane %v773_v9, %v776_v3 }
 0x317   : > { %v786_v15 = vmax.f32 %v784_v11, 0.0  ;;  %v788_v16 = vsub.f32 0.0, %v784_v11  ;;  %v785_v17 = vadd.f32 %v781_v14, %v688_v13 }
 0x319   : > { %v790_v19 = vmax.f32 %v788_v16, 0.0  ;;  %v800_v20 = vmul.f32 %v786_v15, %v1247_v12  ;;  %v787_v21 = vmax.f32 %v785_v17, 0.0  ;;  %v789_v22 = vsub.f32 0.0, %v785_v17 }
 0x31b   : > { %v792_v23 = vmul.f32 %v790_v19, %v1249_v18  ;;  %v802_v24 = vmul.f32 %v800_v20, %v786_v15  ;;  %v791_v25 = vmax.f32 %v789_v22, 0.0  ;;  %v801_v26 = vmul.f32 %v787_v21, %v1247_v12 }
 0x31d   : > { %v794_v27 = vmul.f32 %v792_v23, %v790_v19  ;;  %v804_v28 = vadd.f32 1.0, %v802_v24  ;;  %v793_v29 = vmul.f32 %v791_v25, %v1249_v18  ;;  %v803_v30 = vmul.f32 %v801_v26, %v787_v21  ;;  %v974_v18 = vld [vmem:[%s1320_s10] ss:$0 sm:$0xff] }
 0x31f   : > { %v796_v31 = vadd.f32 1.0, %v794_v27  ;;  %v795_v32 = vmul.f32 %v793_v29, %v791_v25  ;;  %v805_v33 = vadd.f32 1.0, %v803_v30  ;;  %1079 = vrcp.f32 %v804_v28 }
 0x321   : > { %1081 = vrcp.f32 %v796_v31  ;;  %v797_v34 = vadd.f32 1.0, %v795_v32 }
 0x322   : > { %1083 = vrcp.f32 %v805_v33 }
 0x323   : > { %1085 = vrcp.f32 %v797_v34 }
 0x329   : > { %v1080_v35 = vpop.eup %1079 }
 0x32b   : > { %v1082_v36 = vpop.eup %1081 }
 0x32c   : > { %v1084_v37 = vpop.eup %1083  ;;  %v808_v39 = vsub.f32 %v1082_v36, %v1080_v35 }
 0x32d   : > { %v1086_v38 = vpop.eup %1085 }
 0x32e   : > { %v809_v12 = vsub.f32 %v1086_v38, %v1084_v37 }
 0x330   : > { %v810_v40 = vpack.c.bf16 %v809_v12, %v808_v39 }
 0x332   : > { %1029 = vmatmul.mubr.msk.bf16.vlgmr.msra.gmra.mrb[8].mxu0 %vm433_vm1, %v810_v40 }
 0x405   : > { %v871_v41 = vpop.f32.mrb[8].mxu0 }
 0x406   : > { %v872_v42 = vadd.f32 %v974_v18, %v871_v41  ;;  %v1030_v43 = vpop.f32.mrb[9].mxu0 }
 0x407   : > { %v874_v44 = vpop.f32.mrb[10].mxu0 }
 0x408   : > { %878 = vst.msk [vmem:[%s402_s27] sm:$0xff] %vm433_vm1, %v872_v42  ;;  %v875_v45 = vadd.f32 %v974_v18, %v874_v44  ;;  %v1031_v46 = vpop.f32.mrb[11].mxu0 }
 0x40a   : > { %879 = vst.msk [vmem:[%s402_s27 + $0x8] sm:$0xff] %vm433_vm1, %v875_v45 }
 0x40b PF: > { %s22_s17 = sadd.s32 1, %s1112_s17  }
 0x40c   : > { %p19_p1 = scmp.ge.s32.totalorder %s22_s17, 6  }
 0x40e   :  { %21 = sbr.rel (!%p19_p1) target bundleno = 1 (0x1), region = 99 }
 0x415   :  { %902 = vsyncpa [#allocation3], 1 }
 0x416   :  { %904 = vsyncpa [#allocation3 + $0x1], 1 }

</bundles_post_ra>
